<compile_context>
chip_gen: v5e
topology: v5e:2x2
jax: 0.10.0
libtpu: 0.0.40
codegen_flags: <defaults>
</compile_context>

<pallas_src>
import functools

import numpy as np

import jax
import jax.numpy as jnp
from jax import lax
from jax.experimental import pallas as pl
from jax.experimental.pallas import tpu as pltpu

_MIB = 1024 * 1024


def _round_up(x, m):
    return (x + m - 1) // m * m


def _vmem_budget_bytes():
    """Scoped VMEM limit: ~75% of physical VMEM, capped at 112 MiB.

    v5e/v6e (128 MiB) -> 96 MiB; v7x (64 MiB) -> 48 MiB; falls back to a value
    that is safe on every generation if the query is unavailable.
    """
    try:
        cap = int(pltpu.get_tpu_info().vmem_capacity_bytes)
    except Exception:
        cap = 64 * _MIB
    return min(112 * _MIB, int(cap * 0.75))


def _pick_tile_m(M, K, C1p, C2p, out_itemsize, vmem_budget, max_tile):
    """Largest 128-multiple row tile that (a) leaves >= 2 grid steps whenever M
    allows it (v7x megacore sharding on the single 'parallel' axis) and
    (b) fits the VMEM budget next to the single-buffered weights."""
    mp128 = _round_up(M, 128)
    # (a) prefer at least 2 grid steps.
    pref = min(max_tile, max(128, (mp128 // 2) // 128 * 128))
    # (b) VMEM: resident weights (single-buffered) + per-step pipelined tiles.
    weight_bytes = K * C1p * 2 + C1p * 4 + C1p * C2p * 2 + C2p * 4
    avail = max(vmem_budget - weight_bytes, 2 * _MIB)
    tile = pref
    while tile > 128:
        per_tile = tile * (2 * K * 2                 # x_col tile, 2 bufs, bf16
                           + 2 * C2p * out_itemsize  # out tile, 2 bufs
                           + C1p * 4)                # f32 intermediate h
        if per_tile <= avail:
            break
        tile -= 128
    return tile


def _scale_pred_kernel(xcol_ref, w1_ref, bnb_ref, w2_ref, b2_ref, out_ref):
    """One (tile_m, 9*Cin) row tile of the flattened image per grid step.

    xcol_ref : (TM, 9*Cin)  bf16 im2col patches
    w1_ref   : (9*Cin, C1p) bf16 3x3 conv weights, BN scale folded, C1 padded
    bnb_ref  : (1, C1p)     f32 folded BN bias (padded with zeros)
    w2_ref   : (C1p, C2p)   bf16 1x1 conv weights, both dims padded
    b2_ref   : (1, C2p)     f32 1x1 conv bias (padded)
    out_ref  : (TM, C2p)    output tile
    """
    # 3x3 conv (+ folded BN scale): single MXU contraction over K = 9*Cin.
    h = jnp.dot(xcol_ref[...], w1_ref[...], preferred_element_type=jnp.float32)
    # BN bias + LeakyReLU(0.1) in f32 on the accumulator.
    h = h + bnb_ref[...]
    h = jnp.where(h > 0, h, 0.1 * h)
    # 1x1 conv with bias: second MXU matmul over C1p.
    y = jnp.dot(h.astype(w2_ref.dtype), w2_ref[...],
                preferred_element_type=jnp.float32) + b2_ref[...]
    out_ref[...] = y.astype(out_ref.dtype)


def scale_prediction_forward(x_nchw, params, num_classes, *,
                             tile_m=None, out_dtype=jnp.float32):
    """Forward pass matching the PyTorch `scale_prediction` module.

    out_dtype=jnp.bfloat16 halves output HBM traffic if downstream tolerates it
    (default f32 to match the PyTorch module's numerics).
    """
    w1, bn_scale, bn_bias, w2, b2 = params
    N, Cin, H, W = x_nchw.shape
    C1 = w1.shape[3]
    C2 = w2.shape[1]
    assert C2 == 3 * (num_classes + 5)
    K = 9 * Cin

    # ---- wrapper-side prep (fused by XLA) -------------------------------
    # Cast to bf16 BEFORE the 9x im2col expansion so the biggest auxiliary
    # tensor is written/read in half the bytes.  NCHW -> NHWC, zero pad,
    # im2col -> (N*H*W, 9*Cin) in (ky, kx, cin) order matching w1.reshape.
    x_nhwc = jnp.transpose(x_nchw, (0, 2, 3, 1)).astype(jnp.bfloat16)
    xpad = jnp.pad(x_nhwc, ((0, 0), (1, 1), (1, 1), (0, 0)))
    patches = [xpad[:, dy:dy + H, dx:dx + W, :]
               for dy in range(3) for dx in range(3)]
    x_col = jnp.concatenate(patches, axis=-1).reshape(N * H * W, K)

    # Lane-dense channel paddings (128 multiples) for the intermediate and the
    # output; zero padding is exactly cancelled by zero weight rows/columns.
    C1p = _round_up(C1, 128)
    C2p = _round_up(C2, 128)

    out_itemsize = np.dtype(out_dtype).itemsize
    vmem_budget = _vmem_budget_bytes()
    max_tile = 1024 if vmem_budget >= 96 * _MIB else 512   # v5e/v6e vs v7x
    M = N * H * W
    if tile_m is None:
        tile_m = _pick_tile_m(M, K, C1p, C2p, out_itemsize, vmem_budget,
                              max_tile)
    Mp = _round_up(M, tile_m)
    if Mp != M:
        x_col = jnp.pad(x_col, ((0, Mp - M), (0, 0)))

    # Fold eval-mode BN scale into the 3x3 weights; keep only the bias.
    w1f = (w1 * bn_scale.reshape(1, 1, 1, C1)).reshape(K, C1)
    w1f = jnp.pad(w1f, ((0, 0), (0, C1p - C1))).astype(jnp.bfloat16)
    bnb = jnp.pad(bn_bias, ((0, 0), (0, C1p - C1))).astype(jnp.float32)
    w2p = jnp.pad(w2, ((0, C1p - C1), (0, C2p - C2))).astype(jnp.bfloat16)
    b2p = jnp.pad(b2, ((0, 0), (0, C2p - C2))).astype(jnp.float32)

    cost = pl.CostEstimate(
        flops=2 * Mp * (K * C1p + C1p * C2p),
        transcendentals=0,
        bytes_accessed=(Mp * K * 2 + K * C1p * 2 + C1p * 4
                        + C1p * C2p * 2 + C2p * 4 + Mp * C2p * out_itemsize))

    out_flat = pl.pallas_call(
        _scale_pred_kernel,
        out_shape=jax.ShapeDtypeStruct((Mp, C2p), out_dtype),
        grid=(Mp // tile_m,),
        in_specs=[
            pl.BlockSpec((tile_m, K), lambda i: (i, 0)),   # im2col rows
            # Grid-invariant operands: single-buffered (constant index_map ->
            # no re-DMA across steps; a second buffer would only waste VMEM).
            pl.BlockSpec((K, C1p), lambda i: (0, 0),
                         pipeline_mode=pl.Buffered(1)),    # folded 3x3 weights
            pl.BlockSpec((1, C1p), lambda i: (0, 0),
                         pipeline_mode=pl.Buffered(1)),    # folded BN bias
            pl.BlockSpec((C1p, C2p), lambda i: (0, 0),
                         pipeline_mode=pl.Buffered(1)),    # 1x1 weights
            pl.BlockSpec((1, C2p), lambda i: (0, 0),
                         pipeline_mode=pl.Buffered(1)),    # 1x1 bias
        ],
        out_specs=pl.BlockSpec((tile_m, C2p), lambda i: (i, 0)),
        compiler_params=pltpu.CompilerParams(
            dimension_semantics=("parallel",),
            vmem_limit_bytes=vmem_budget),
        cost_estimate=cost,
    )(x_col, w1f, bnb, w2p, b2p)

    # Strip row / channel padding, restore NHWC, then the module's
    # reshape(N,3,nc+5,H,W).permute(0,1,3,4,2) expressed from NHWC.
    out_nhwc = out_flat[:M, :C2].reshape(N, H, W, C2)
    return out_nhwc.reshape(N, H, W, 3, num_classes + 5).transpose(0, 3, 1, 2, 4)


def _reference_forward(x_nchw, params, num_classes):
    """Pure-JAX f32 reference (lax.conv) for correctness checking."""
    w1, bn_scale, bn_bias, w2, b2 = params
    N, Cin, H, W = x_nchw.shape
    x_nhwc = jnp.transpose(x_nchw, (0, 2, 3, 1))
    dn = lax.conv_dimension_numbers(x_nhwc.shape, w1.shape, ("NHWC", "HWIO", "NHWC"))
    h = lax.conv_general_dilated(x_nhwc, w1, (1, 1), "SAME", dimension_numbers=dn)
    h = h * bn_scale[0] + bn_bias[0]
    h = jnp.where(h > 0, h, 0.1 * h)
    y = jnp.einsum("nhwc,cd->nhwd", h, w2) + b2[0]
    return y.reshape(N, H, W, 3, num_classes + 5).transpose(0, 3, 1, 2, 4)


def make_params(key, in_channels, num_classes):
    """Deterministic synthetic parameters (shapes match nn.Conv2d / BatchNorm2d)."""
    C1 = 2 * in_channels
    C2 = 3 * (num_classes + 5)
    k = jax.random.split(key, 7)
    w1 = jax.random.normal(k[0], (3, 3, in_channels, C1), jnp.float32) * 0.1
    gamma = 1.0 + 0.1 * jax.random.normal(k[1], (C1,), jnp.float32)
    beta = 0.1 * jax.random.normal(k[2], (C1,), jnp.float32)
    running_mean = 0.1 * jax.random.normal(k[3], (C1,), jnp.float32)
    running_var = jnp.abs(1.0 + 0.1 * jax.random.normal(k[4], (C1,), jnp.float32))
    eps = 1e-5
    inv_std = gamma / jnp.sqrt(running_var + eps)
    bn_scale = inv_std.reshape(1, C1)
    bn_bias = (beta - running_mean * inv_std).reshape(1, C1)
    w2 = jax.random.normal(k[5], (C1, C2), jnp.float32) * 0.1
    b2 = (0.1 * jax.random.normal(k[6], (C2,), jnp.float32)).reshape(1, C2)
    return (w1, bn_scale, bn_bias, w2, b2)


if __name__ == "__main__":
    key = jax.random.PRNGKey(0)
    batch, in_channels, num_classes, H, W = 2, 4, 3, 16, 16

    k_x, k_p = jax.random.split(key)
    x = jax.random.normal(k_x, (batch, in_channels, H, W), jnp.float32)
    params = make_params(k_p, in_channels, num_classes)

    fwd = jax.jit(functools.partial(scale_prediction_forward, num_classes=num_classes))
    out = fwd(x, params)
    out = jax.block_until_ready(out)

    expected_shape = (batch, 3, H, W, num_classes + 5)
    assert out.shape == expected_shape, (out.shape, expected_shape)

    ref = _reference_forward(x, params, num_classes)
    # bf16 MXU operands with f32 accumulation: tolerance loosened accordingly.
    assert jnp.allclose(out, ref, atol=5e-2, rtol=5e-2), "mismatch vs JAX reference"

    print("KERNEL_OK")
</pallas_src>

<mosaic_0001>
module attributes {stable_mosaic.version = 11 : i64} {
  func.func @_scale_pred_kernel(%arg0: i32, %arg1: memref<256x36xbf16, #tpu.memory_space<vmem>>, %arg2: memref<36x128xbf16, #tpu.memory_space<vmem>>, %arg3: memref<1x128xf32, #tpu.memory_space<vmem>>, %arg4: memref<128x128xbf16, #tpu.memory_space<vmem>>, %arg5: memref<1x128xf32, #tpu.memory_space<vmem>>, %arg6: memref<256x128xf32, #tpu.memory_space<vmem>>) attributes {dimension_semantics = [#tpu.dimension_semantics<parallel>], iteration_bounds = array<i64: 2>, scalar_prefetch = 0 : i64, scratch_operands = 0 : i64, tpu.core_type = #tpu.core_type<tc>, window_params = [{transform_indices = @transform_0, window_bounds = array<i64: 256, 36>}, {pipeline_mode = #tpu.pipeline_mode<synchronous>, transform_indices = @transform_1, window_bounds = array<i64: 36, 128>}, {pipeline_mode = #tpu.pipeline_mode<synchronous>, transform_indices = @transform_2, window_bounds = array<i64: 1, 128>}, {pipeline_mode = #tpu.pipeline_mode<synchronous>, transform_indices = @transform_3, window_bounds = array<i64: 128, 128>}, {pipeline_mode = #tpu.pipeline_mode<synchronous>, transform_indices = @transform_4, window_bounds = array<i64: 1, 128>}, {transform_indices = @transform_5, window_bounds = array<i64: 256, 128>}]} {
    %c0 = arith.constant 0 : index
    %c0_0 = arith.constant 0 : index
    %0 = vector.load %arg1[%c0, %c0_0] : memref<256x36xbf16, #tpu.memory_space<vmem>>, vector<256x36xbf16>
    %c0_1 = arith.constant 0 : index
    %c0_2 = arith.constant 0 : index
    %1 = vector.load %arg2[%c0_1, %c0_2] : memref<36x128xbf16, #tpu.memory_space<vmem>>, vector<36x128xbf16>
    %cst = arith.constant dense<0.000000e+00> : vector<256x128xf32>
    %2 = tpu.matmul %0, %1, %cst {dimension_numbers = #tpu.dot_dimension_numbers<[1], [0], [0], [1], [0, 0, 1, 1], [], []>} : vector<256x36xbf16>, vector<36x128xbf16>, vector<256x128xf32> -> vector<256x128xf32>
    %c0_3 = arith.constant 0 : index
    %c0_4 = arith.constant 0 : index
    %3 = vector.load %arg3[%c0_3, %c0_4] : memref<1x128xf32, #tpu.memory_space<vmem>>, vector<1x128xf32>
    %4 = vector.broadcast %3 : vector<1x128xf32> to vector<256x128xf32>
    %5 = arith.addf %2, %4 : vector<256x128xf32>
    %cst_5 = arith.constant 0.000000e+00 : f32
    %6 = vector.broadcast %cst_5 : f32 to vector<256x128xf32>
    %7 = arith.cmpf ogt, %5, %6 : vector<256x128xf32>
    %cst_6 = arith.constant 1.000000e-01 : f32
    %8 = vector.broadcast %cst_6 : f32 to vector<256x128xf32>
    %9 = arith.mulf %8, %5 : vector<256x128xf32>
    %10 = arith.select %7, %5, %9 : vector<256x128xi1>, vector<256x128xf32>
    %11 = arith.truncf %10 : vector<256x128xf32> to vector<256x128xbf16>
    %c0_7 = arith.constant 0 : index
    %c0_8 = arith.constant 0 : index
    %12 = vector.load %arg4[%c0_7, %c0_8] : memref<128x128xbf16, #tpu.memory_space<vmem>>, vector<128x128xbf16>
    %cst_9 = arith.constant dense<0.000000e+00> : vector<256x128xf32>
    %13 = tpu.matmul %11, %12, %cst_9 {dimension_numbers = #tpu.dot_dimension_numbers<[1], [0], [0], [1], [0, 0, 1, 1], [], []>} : vector<256x128xbf16>, vector<128x128xbf16>, vector<256x128xf32> -> vector<256x128xf32>
    %c0_10 = arith.constant 0 : index
    %c0_11 = arith.constant 0 : index
    %14 = vector.load %arg5[%c0_10, %c0_11] : memref<1x128xf32, #tpu.memory_space<vmem>>, vector<1x128xf32>
    %15 = vector.broadcast %14 : vector<1x128xf32> to vector<256x128xf32>
    %16 = arith.addf %13, %15 : vector<256x128xf32>
    %c0_12 = arith.constant 0 : index
    %c0_13 = arith.constant 0 : index
    %17 = vector.load %arg6[%c0_12, %c0_13] : memref<256x128xf32, #tpu.memory_space<vmem>>, vector<256x128xf32>
    tpu.vector_store %arg6[%c0_12, %c0_13], %16 {strides = array<i32>} : memref<256x128xf32, #tpu.memory_space<vmem>>, vector<256x128xf32>,
    return
  }
  func.func @transform_0(%arg0: i32) -> (i32, i32) {
    %c0_i32 = arith.constant 0 : i32
    %c0_i32_0 = arith.constant 0 : i32
    return %arg0, %c0_i32 : i32, i32
  }
  func.func @transform_1(%arg0: i32) -> (i32, i32) {
    %c0_i32 = arith.constant 0 : i32
    %c0_i32_0 = arith.constant 0 : i32
    %c0_i32_1 = arith.constant 0 : i32
    return %c0_i32, %c0_i32_0 : i32, i32
  }
  func.func @transform_2(%arg0: i32) -> (i32, i32) {
    %c0_i32 = arith.constant 0 : i32
    %c0_i32_0 = arith.constant 0 : i32
    %c0_i32_1 = arith.constant 0 : i32
    return %c0_i32, %c0_i32_0 : i32, i32
  }
  func.func @transform_3(%arg0: i32) -> (i32, i32) {
    %c0_i32 = arith.constant 0 : i32
    %c0_i32_0 = arith.constant 0 : i32
    %c0_i32_1 = arith.constant 0 : i32
    return %c0_i32, %c0_i32_0 : i32, i32
  }
  func.func @transform_4(%arg0: i32) -> (i32, i32) {
    %c0_i32 = arith.constant 0 : i32
    %c0_i32_0 = arith.constant 0 : i32
    %c0_i32_1 = arith.constant 0 : i32
    return %c0_i32, %c0_i32_0 : i32, i32
  }
  func.func @transform_5(%arg0: i32) -> (i32, i32) {
    %c0_i32 = arith.constant 0 : i32
    %c0_i32_0 = arith.constant 0 : i32
    return %arg0, %c0_i32 : i32, i32
  }
}

</mosaic_0001>

<bundles_post_ra>
// kernel: scale_prediction_forward.1
= control target key start
LH: loop header
LB: loop body
LE: loop exit
PB: predicated region body
PF: predicated region fallthrough
CT: control target
= control target key end

     0   :  { %s1080_s18 = smov 0   ;;  %s1276_s0 = inlined_call_operand.vmem [shape: bf16[512,36], index: 0, kind: input, shape index: {}]   ;;  %s1277_s1 = inlined_call_operand.vmem [shape: bf16[36,128], index: 1, kind: input, shape index: {}]   ;;  %s1278_s2 = inlined_call_operand.vmem [shape: f32[1,128], index: 2, kind: input, shape index: {}]   ;;  %s1279_s3 = inlined_call_operand.vmem [shape: bf16[128,128], index: 3, kind: input, shape index: {}]   ;;  %s1280_s4 = inlined_call_operand.vmem [shape: f32[1,128], index: 4, kind: input, shape index: {}]   ;;  %s1281_s5 = inlined_call_operand.vmem [shape: f32[512,128], index: 5, kind: output, shape index: {}]  }
   0x1 LB: > { %s864_s19 = sadd.s32 4294967295, %s1048_s18   ;;  %p868_p0 = scmp.ge.s32.totalorder %s1048_s18, 1  ;;  %s1048_s18 = sphi %s1080_s18, %s15_s18  }
   0x2   : > { %p188_p1 = scmp.lt.s32.totalorder %s1048_s18, 3 }
   0x4   : > { %p189_p2 = pnand %p868_p0, %p188_p1 }
   0x5   : > { %s869_s22 = sshll.u32 (!%p189_p2), %s864_s19, 5 }
   0x6   : > { %192 = sbr.rel (%p189_p2) target bundleno = 552 (0x228), region = 40  ;;  %p217_p3 = scmp.lt.s32.totalorder (!%p189_p2), %s869_s22, 63 }
   0xb   : > { %v265_v0 = vld [vmem:[%s1277_s1 + $0x10] sm:$0x3]  ;;  %vm414_vm0 = vcmask 1041408   ;;  %s1283_s22 = smov (!%p217_p3, %s869_s22), 63  ;;  %v1012_v4 = vld [vmem:[%s1277_s1 + $0x8] sm:$0xff]  ;;  %v1011_v5 = vld [vmem:[%s1277_s1] sm:$0xff] }
   0xc   : > { %v359_v1 = vunpack.c.l.b16 %v265_v0  ;;  %s870_s25 = sshll.u32 %s1283_s22, 2  ;;  %vm365_vm1 = vcmask 293888   ;;  %v1020_v11 = vld [vmem:[%s1279_s3 + $0x38] sm:$0xff]  ;;  %v1019_v13 = vld [vmem:[%s1279_s3 + $0x30] sm:$0xff]  ;;  %v1018_v14 = vld [vmem:[%s1279_s3 + $0x28] sm:$0xff]  ;;  %s872_s26 = sshll.u32 %s1283_s22, 3 }
   0xd   : > { %s1103_s30 = scalar_lea.vmem %s1276_s0, %s870_s25  ;;  %687 = vmatpush.bf16.msra.mxu1 %v1020_v11  ;;  %1024 = vmatpush.bf16.msra.mxu2 %v1020_v11  ;;  %v1017_v15 = vld [vmem:[%s1279_s3 + $0x20] sm:$0xff]  ;;  %v1016_v17 = vld [vmem:[%s1279_s3 + $0x18] sm:$0xff]  ;;  %v1015_v19 = vld [vmem:[%s1279_s3 + $0x10] sm:$0xff]  ;;  %s1193_s6 = scalar_lea.vmem %s1281_s5, %s872_s26 }
   0xe   : > { %v362_v2 = vpack.c.b16 %v359_v1, %v359_v1  ;;  %v995_v6 = vld [vmem:[%s1103_s30] sm:$0xff]  ;;  %v996_v7 = vld [vmem:[%s1103_s30 + $0x8] sm:$0xff]  ;;  %v997_v8 = vld [vmem:[%s1103_s30 + $0x10] sm:$0xff] }
   0xf   : > { %v998_v9 = vld [vmem:[%s1103_s30 + $0x18] sm:$0xff]  ;;  %v999_v10 = vld [vmem:[%s1103_s30 + $0x20] sm:$0xff]  ;;  %v1000_v12 = vld [vmem:[%s1103_s30 + $0x28] sm:$0xff] }
  0x10   : > { %v416_v3 = vsel %vm414_vm0, %v362_v2, 0  ;;  %v1001_v16 = vld [vmem:[%s1103_s30 + $0x30] sm:$0xff]  ;;  %v1004_v18 = vld [vmem:[%s1103_s30 + $0x48] sm:$0xff]  ;;  %v1013_v21 = vld [vmem:[%s1279_s3] sm:$0xff] }
  0x11   : > { %423 = vmatpush.bf16.msra.mxu0 %v416_v3  ;;  %1021 = vmatpush.bf16.msra.mxu3 %v416_v3  ;;  %v1014_v20 = vld [vmem:[%s1279_s3 + $0x8] sm:$0xff]  ;;  %v1002_v22 = vld [vmem:[%s1103_s30 + $0x38] sm:$0xff]  ;;  %v1005_v23 = vld [vmem:[%s1103_s30 + $0x50] sm:$0xff] }
  0x12   : > { %688 = vmatpush.bf16.msra.mxu1 %v1019_v13  ;;  %1025 = vmatpush.bf16.msra.mxu2 %v1019_v13  ;;  %v1003_v24 = vld [vmem:[%s1103_s30 + $0x40] sm:$0xff]  ;;  %v1006_v27 = vld [vmem:[%s1103_s30 + $0x58] sm:$0xff]  ;;  %v1008_v47 = vld [vmem:[%s1103_s30 + $0x68] sm:$0xff] }
  0x13   : > { %v1153_v26 = vld [vmem:[%s1278_s2] ss:$0 sm:$0xff]  ;;  %v1009_v57 = vld [vmem:[%s1103_s30 + $0x70] sm:$0xff]  ;;  %v1010_v3 = vld [vmem:[%s1103_s30 + $0x78] sm:$0xff] }
  0x14   : > { %v1007_v37 = vld [vmem:[%s1103_s30 + $0x60] sm:$0xff] }
  0x15   : > { %424 = vmatpush.bf16.msra.mxu0 %v1012_v4  ;;  %1022 = vmatpush.bf16.msra.mxu3 %v1012_v4 }
  0x16   : > { %689 = vmatpush.bf16.msra.mxu1 %v1018_v14  ;;  %1026 = vmatpush.bf16.msra.mxu2 %v1018_v14 }
  0x19   : > { %425 = vmatpush.bf16.msra.mxu0 %v1011_v5  ;;  %1023 = vmatpush.bf16.msra.mxu3 %v1011_v5 }
  0x1a   : > { %690 = vmatpush.bf16.msra.mxu1 %v1017_v15  ;;  %1027 = vmatpush.bf16.msra.mxu2 %v1017_v15 }
  0x1c   : > { %945 = vmatmul.msk.bf16.vlgmr.msra.gmra.mxu0 %vm365_vm1, %v995_v6  ;;  %954 = vmatmul.msk.bf16.vlgmr.msra.gmra.mxu3 %vm365_vm1, %v1004_v18 }
  0x1e   : > { %691 = vmatpush.bf16.msra.mxu1 %v1016_v17  ;;  %1028 = vmatpush.bf16.msra.mxu2 %v1016_v17 }
  0x22   : > { %692 = vmatpush.bf16.msra.mxu1 %v1015_v19  ;;  %1029 = vmatpush.bf16.msra.mxu2 %v1015_v19 }
  0x26   : > { %693 = vmatpush.bf16.msra.mxu1 %v1014_v20  ;;  %1030 = vmatpush.bf16.msra.mxu2 %v1014_v20 }
  0x2a   : > { %694 = vmatpush.bf16.msra.mxu1 %v1013_v21  ;;  %1031 = vmatpush.bf16.msra.mxu2 %v1013_v21 }
  0x2c   : > { %946 = vmatmul.msk.bf16.gmra.mxu0 %vm365_vm1, %v996_v7  ;;  %955 = vmatmul.msk.bf16.gmra.mxu3 %vm365_vm1, %v1005_v23 }
  0x3c   : > { %947 = vmatmul.msk.bf16.gmra.mxu0 %vm365_vm1, %v997_v8  ;;  %956 = vmatmul.msk.bf16.gmra.mxu3 %vm365_vm1, %v1006_v27 }
  0x4c   : > { %948 = vmatmul.msk.bf16.gmra.mxu0 %vm365_vm1, %v998_v9  ;;  %957 = vmatmul.msk.bf16.gmra.mxu3 %vm365_vm1, %v1007_v37 }
  0x5c   : > { %949 = vmatmul.msk.bf16.gmra.mxu0 %vm365_vm1, %v999_v10  ;;  %958 = vmatmul.msk.bf16.gmra.mxu3 %vm365_vm1, %v1008_v47 }
  0x6c   : > { %950 = vmatmul.msk.bf16.gmra.mxu0 %vm365_vm1, %v1000_v12  ;;  %959 = vmatmul.msk.bf16.gmra.mxu3 %vm365_vm1, %v1009_v57 }
  0x7c   : > { %951 = vmatmul.msk.bf16.gmra.mxu0 %vm365_vm1, %v1001_v16  ;;  %960 = vmatmul.msk.bf16.gmra.mxu3 %vm365_vm1, %v1010_v3 }
  0x8c   : > { %952 = vmatmul.msk.bf16.gmra.mxu0 %vm365_vm1, %v1002_v22 }
  0x99   : > { %v427_v25 = vpop.f32.mrf.mxu0 }
  0x9a   : > { %v428_v28 = vadd.f32 %v1153_v26, %v427_v25 }
  0x9c   : > { %953 = vmatmul.msk.bf16.gmra.mxu0 %vm365_vm1, %v1003_v24  ;;  %v539_v30 = vmul.f32 0.1, %v428_v28  ;;  %vm507_vm2 = vcmp.gt.f32.partialorder %v428_v28, 0.0 }
  0x9e   : > { %v571_v33 = vsel %vm507_vm2, %v428_v28, %v539_v30 }
  0xa1   : > { %v429_v29 = vpop.f32.mrf.mxu0 }
  0xa2   : > { %v430_v31 = vadd.f32 %v1153_v26, %v429_v29 }
  0xa4   : > { %v540_v32 = vmul.f32 0.1, %v430_v31  ;;  %vm508_vm3 = vcmp.gt.f32.partialorder %v430_v31, 0.0 }
  0xa6   : > { %v572_v34 = vsel %vm508_vm3, %v430_v31, %v540_v32  ;;  %v472_v31 = vpop.f32.mrf.mxu3 }
  0xa7   : > { %v603_v35 = vpack.c.bf16 %v572_v34, %v571_v33 }
  0xa9   : > { %v432_v36 = vpop.f32.mrf.mxu0  ;;  %695 = vmatmul.bf16.vlgmr.msra.gmra.mxu1 %v603_v35 }
  0xaa   : > { %v433_v38 = vadd.f32 %v1153_v26, %v432_v36 }
  0xac   : > { %v541_v40 = vmul.f32 0.1, %v433_v38  ;;  %vm509_vm4 = vcmp.gt.f32.partialorder %v433_v38, 0.0 }
  0xae   : > { %v573_v43 = vsel %vm509_vm4, %v433_v38, %v541_v40  ;;  %v474_v35 = vpop.f32.mrf.mxu3 }
  0xaf   : > { %v475_v57 = vadd.f32 %v1153_v26, %v474_v35 }
  0xb1   : > { %v434_v39 = vpop.f32.mrf.mxu0 }
  0xb2   : > { %v435_v41 = vadd.f32 %v1153_v26, %v434_v39 }
  0xb4   : > { %v542_v42 = vmul.f32 0.1, %v435_v41  ;;  %vm510_vm5 = vcmp.gt.f32.partialorder %v435_v41, 0.0 }
  0xb6   : > { %v574_v44 = vsel %vm510_vm5, %v435_v41, %v542_v42  ;;  %vm526_vm5 = vcmp.gt.f32.partialorder %v475_v57, 0.0 }
  0xb7   : > { %v604_v45 = vpack.c.bf16 %v574_v44, %v573_v43  ;;  %v477_v43 = vpop.f32.mrf.mxu3 }
  0xb9   : > { %v437_v46 = vpop.f32.mrf.mxu0  ;;  %700 = vmatmul.bf16.gmra.mxu1 %v604_v45 }
  0xba   : > { %v438_v48 = vadd.f32 %v1153_v26, %v437_v46 }
  0xbc   : > { %v543_v50 = vmul.f32 0.1, %v438_v48  ;;  %vm511_vm6 = vcmp.gt.f32.partialorder %v438_v48, 0.0 }
  0xbe   : > { %v575_v53 = vsel %vm511_vm6, %v438_v48, %v543_v50  ;;  %v1188_v48 = vld [vmem:[%s1280_s4] ss:$0 sm:$0xff] }
  0xbf   : > { %v479_v50 = vpop.f32.mrf.mxu3 }
  0xc1   : > { %v439_v49 = vpop.f32.mrf.mxu0 }
  0xc2   : > { %v440_v51 = vadd.f32 %v1153_v26, %v439_v49 }
  0xc4   : > { %v544_v52 = vmul.f32 0.1, %v440_v51  ;;  %vm512_vm7 = vcmp.gt.f32.partialorder %v440_v51, 0.0 }
  0xc6   : > { %v576_v54 = vsel %vm512_vm7, %v440_v51, %v544_v52 }
  0xc7   : > { %v605_v55 = vpack.c.bf16 %v576_v54, %v575_v53 }
  0xc9   : > { %v442_v56 = vpop.f32.mrf.mxu0  ;;  %705 = vmatmul.bf16.gmra.mxu1 %v605_v55 }
  0xca   : > { %v443_v58 = vadd.f32 %v1153_v26, %v442_v56  ;;  %v473_v56 = vadd.f32 %v1153_v26, %v472_v31 }
  0xcc   : > { %v545_v60 = vmul.f32 0.1, %v443_v58  ;;  %vm513_vm8 = vcmp.gt.f32.partialorder %v443_v58, 0.0  ;;  %vm525_vm4 = vcmp.gt.f32.partialorder %v473_v56, 0.0 }
  0xce   : > { %v577_v63 = vsel %vm513_vm8, %v443_v58, %v545_v60  ;;  %v482_v60 = vpop.f32.mrf.mxu3 }
  0xd1   : > { %v444_v59 = vpop.f32.mrf.mxu0 }
  0xd2   : > { %v445_v61 = vadd.f32 %v1153_v26, %v444_v59 }
  0xd4   : > { %v546_v62 = vmul.f32 0.1, %v445_v61  ;;  %vm514_vm9 = vcmp.gt.f32.partialorder %v445_v61, 0.0 }
  0xd6   : > { %v578_v0 = vsel %vm514_vm9, %v445_v61, %v546_v62  ;;  %v557_v61 = vmul.f32 0.1, %v473_v56  ;;  %v558_v62 = vmul.f32 0.1, %v475_v57 }
  0xd7   : > { %v606_v1 = vpack.c.bf16 %v578_v0, %v577_v63 }
  0xd8   : > { %v589_v63 = vsel %vm525_vm4, %v473_v56, %v557_v61  ;;  %v590_v0 = vsel %vm526_vm5, %v475_v57, %v558_v62 }
  0xd9   : > { %v447_v2 = vpop.f32.mrf.mxu0  ;;  %710 = vmatmul.bf16.gmra.mxu1 %v606_v1  ;;  %v612_v3 = vpack.c.bf16 %v590_v0, %v589_v63 }
  0xda   : > { %v448_v4 = vadd.f32 %v1153_v26, %v447_v2 }
  0xdc   : > { %v547_v6 = vmul.f32 0.1, %v448_v4  ;;  %vm515_vm10 = vcmp.gt.f32.partialorder %v448_v4, 0.0 }
  0xde   : > { %v579_v9 = vsel %vm515_vm10, %v448_v4, %v547_v6  ;;  %v484_v4 = vpop.f32.mrf.mxu3  ;;  %v480_v6 = vadd.f32 %v1153_v26, %v479_v50 }
  0xe0   : > { %vm528_vm7 = vcmp.gt.f32.partialorder %v480_v6, 0.0 }
  0xe1   : > { %v449_v5 = vpop.f32.mrf.mxu0 }
  0xe2   : > { %v450_v7 = vadd.f32 %v1153_v26, %v449_v5  ;;  %v478_v5 = vadd.f32 %v1153_v26, %v477_v43 }
  0xe4   : > { %v548_v8 = vmul.f32 0.1, %v450_v7  ;;  %vm516_vm11 = vcmp.gt.f32.partialorder %v450_v7, 0.0  ;;  %vm527_vm6 = vcmp.gt.f32.partialorder %v478_v5, 0.0 }
  0xe6   : > { %v580_v10 = vsel %vm516_vm11, %v450_v7, %v548_v8 }
  0xe7   : > { %v607_v11 = vpack.c.bf16 %v580_v10, %v579_v9  ;;  %v559_v9 = vmul.f32 0.1, %v478_v5  ;;  %v560_v10 = vmul.f32 0.1, %v480_v6 }
  0xe9   : > { %v452_v12 = vpop.f32.mrf.mxu0  ;;  %715 = vmatmul.bf16.gmra.mxu1 %v607_v11  ;;  %v487_v11 = vpop.f32.mrf.mxu3 }
  0xea   : > { %v453_v13 = vadd.f32 %v1153_v26, %v452_v12  ;;  %v591_v12 = vsel %vm527_vm6, %v478_v5, %v559_v9  ;;  %v488_v31 = vadd.f32 %v1153_v26, %v487_v11 }
  0xec   : > { %v549_v15 = vmul.f32 0.1, %v453_v13  ;;  %vm517_vm12 = vcmp.gt.f32.partialorder %v453_v13, 0.0  ;;  %v563_v35 = vmul.f32 0.1, %v488_v31  ;;  %vm531_vm10 = vcmp.gt.f32.partialorder %v488_v31, 0.0 }
  0xee   : > { %v581_v18 = vsel %vm517_vm12, %v453_v13, %v549_v15  ;;  %v592_v13 = vsel %vm528_vm7, %v480_v6, %v560_v10 }
  0xf1   : > { %v454_v14 = vpop.f32.mrf.mxu0 }
  0xf2   : > { %v455_v16 = vadd.f32 %v1153_v26, %v454_v14 }
  0xf4   : > { %v550_v17 = vmul.f32 0.1, %v455_v16  ;;  %vm518_vm13 = vcmp.gt.f32.partialorder %v455_v16, 0.0 }
  0xf6   : > { %v582_v19 = vsel %vm518_vm13, %v455_v16, %v550_v17  ;;  %v613_v16 = vpack.c.bf16 %v592_v13, %v591_v12  ;;  %v483_v17 = vadd.f32 %v1153_v26, %v482_v60 }
  0xf7   : > { %v608_v20 = vpack.c.bf16 %v582_v19, %v581_v18  ;;  %v485_v18 = vadd.f32 %v1153_v26, %v484_v4  ;;  %v489_v19 = vpop.f32.mrf.mxu3 }
  0xf8   : > { %vm529_vm8 = vcmp.gt.f32.partialorder %v483_v17, 0.0 }
  0xf9   : > { %v457_v21 = vpop.f32.mrf.mxu0  ;;  %720 = vmatmul.bf16.gmra.mxu1 %v608_v20  ;;  %vm530_vm9 = vcmp.gt.f32.partialorder %v485_v18, 0.0 }
  0xfa   : > { %v458_v22 = vadd.f32 %v1153_v26, %v457_v21 }
  0xfc   : > { %v551_v24 = vmul.f32 0.1, %v458_v22  ;;  %vm519_vm14 = vcmp.gt.f32.partialorder %v458_v22, 0.0 }
  0xfe   : > { %v583_v28 = vsel %vm519_vm14, %v458_v22, %v551_v24  ;;  %v561_v22 = vmul.f32 0.1, %v483_v17 }
 0x100   : > { %v593_v24 = vsel %vm529_vm8, %v483_v17, %v561_v22 }
 0x101   : > { %v459_v23 = vpop.f32.mrf.mxu0 }
 0x102   : > { %v460_v25 = vadd.f32 %v1153_v26, %v459_v23  ;;  %v562_v23 = vmul.f32 0.1, %v485_v18 }
 0x104   : > { %v552_v27 = vmul.f32 0.1, %v460_v25  ;;  %vm520_vm15 = vcmp.gt.f32.partialorder %v460_v25, 0.0 }
 0x106   : > { %v584_v29 = vsel %vm520_vm15, %v460_v25, %v552_v27  ;;  %v594_v25 = vsel %vm530_vm9, %v485_v18, %v562_v23 }
 0x107   : > { %v609_v30 = vpack.c.bf16 %v584_v29, %v583_v28  ;;  %v614_v29 = vpack.c.bf16 %v594_v25, %v593_v24 }
 0x109   : > { %v462_v32 = vpop.f32.mrf.mxu0  ;;  %725 = vmatmul.bf16.gmra.mxu1 %v609_v30  ;;  %v492_v30 = vpop.f32.mrf.mxu3 }
 0x10a   : > { %v463_v33 = vadd.f32 %v1153_v26, %v462_v32  ;;  %v490_v32 = vadd.f32 %v1153_v26, %v489_v19 }
 0x10c   : > { %v553_v36 = vmul.f32 0.1, %v463_v33  ;;  %vm521_vm0 = vcmp.gt.f32.partialorder %v463_v33, 0.0  ;;  %vm532_vm11 = vcmp.gt.f32.partialorder %v490_v32, 0.0 }
 0x10e   : > { %v585_v39 = vsel %vm521_vm0, %v463_v33, %v553_v36  ;;  %v564_v36 = vmul.f32 0.1, %v490_v32 }
 0x111   : > { %v464_v34 = vpop.f32.mrf.mxu0 }
 0x112   : > { %v465_v37 = vadd.f32 %v1153_v26, %v464_v34 }
 0x114   : > { %v554_v38 = vmul.f32 0.1, %v465_v37  ;;  %vm522_vm1 = vcmp.gt.f32.partialorder %v465_v37, 0.0 }
 0x116   : > { %v586_v40 = vsel %vm522_vm1, %v465_v37, %v554_v38  ;;  %v494_v37 = vpop.f32.mrf.mxu3  ;;  %v595_v38 = vsel %vm531_vm10, %v488_v31, %v563_v35 }
 0x117   : > { %v610_v41 = vpack.c.bf16 %v586_v40, %v585_v39  ;;  %v596_v39 = vsel %vm532_vm11, %v490_v32, %v564_v36 }
 0x119   : > { %v467_v42 = vpop.f32.mrf.mxu0  ;;  %730 = vmatmul.bf16.gmra.mxu1 %v610_v41 }
 0x11a   : > { %v468_v44 = vadd.f32 %v1153_v26, %v467_v42  ;;  %v615_v42 = vpack.c.bf16 %v596_v39, %v595_v38 }
 0x11c   : > { %v555_v46 = vmul.f32 0.1, %v468_v44  ;;  %vm523_vm2 = vcmp.gt.f32.partialorder %v468_v44, 0.0 }
 0x11e   : > { %v587_v52 = vsel %vm523_vm2, %v468_v44, %v555_v46  ;;  %v497_v43 = vpop.f32.mrf.mxu3  ;;  %v493_v44 = vadd.f32 %v1153_v26, %v492_v30 }
 0x11f   : > { %v498_v57 = vadd.f32 %v1153_v26, %v497_v43 }
 0x120   : > { %vm533_vm12 = vcmp.gt.f32.partialorder %v493_v44, 0.0 }
 0x121   : > { %v469_v45 = vpop.f32.mrf.mxu0  ;;  %v567_v62 = vmul.f32 0.1, %v498_v57  ;;  %vm535_vm14 = vcmp.gt.f32.partialorder %v498_v57, 0.0 }
 0x122   : > { %v470_v47 = vadd.f32 %v1153_v26, %v469_v45  ;;  %v495_v45 = vadd.f32 %v1153_v26, %v494_v37 }
 0x123   : > { %v599_v0 = vsel %vm535_vm14, %v498_v57, %v567_v62 }
 0x124   : > { %v556_v49 = vmul.f32 0.1, %v470_v47  ;;  %vm524_vm3 = vcmp.gt.f32.partialorder %v470_v47, 0.0  ;;  %v566_v50 = vmul.f32 0.1, %v495_v45  ;;  %vm534_vm13 = vcmp.gt.f32.partialorder %v495_v45, 0.0 }
 0x126   : > { %v696_v51 = vpop.f32.mrf.mxu1  ;;  %v588_v53 = vsel %vm524_vm3, %v470_v47, %v556_v49  ;;  %v565_v49 = vmul.f32 0.1, %v493_v44 }
 0x127   : > { %v697_v54 = vadd.f32 %v1188_v48, %v696_v51  ;;  %v611_v55 = vpack.c.bf16 %v588_v53, %v587_v52  ;;  %v598_v52 = vsel %vm534_vm13, %v495_v45, %v566_v50  ;;  %v499_v53 = vpop.f32.mrf.mxu3 }
 0x128   : > { %v597_v51 = vsel %vm533_vm12, %v493_v44, %v565_v49 }
 0x129   : > { %776 = vst [vmem:[%s1193_s6] sm:$0xff] %v697_v54  ;;  %735 = vmatmul.bf16.vlgmr.msra.gmra.mxu2 %v611_v55  ;;  %v616_v56 = vpack.c.bf16 %v598_v52, %v597_v51 }
 0x12e   : > { %v698_v58 = vpop.f32.mrf.mxu1 }
 0x12f   : > { %v699_v59 = vadd.f32 %v1188_v48, %v698_v58  ;;  %v500_v58 = vadd.f32 %v1153_v26, %v499_v53  ;;  %v502_v61 = vpop.f32.mrf.mxu3 }
 0x130   : > { %v503_v6 = vadd.f32 %v1153_v26, %v502_v61 }
 0x131   : > { %777 = vst [vmem:[%s1193_s6 + $0x8] sm:$0xff] %v699_v59  ;;  %v568_v63 = vmul.f32 0.1, %v500_v58  ;;  %vm536_vm15 = vcmp.gt.f32.partialorder %v500_v58, 0.0 }
 0x132   : > { %v569_v10 = vmul.f32 0.1, %v503_v6  ;;  %vm537_vm0 = vcmp.gt.f32.partialorder %v503_v6, 0.0 }
 0x134   : > { %v601_v12 = vsel %vm537_vm0, %v503_v6, %v569_v10 }
 0x136   : > { %v701_v1 = vpop.f32.mrf.mxu1 }
 0x137   : > { %v702_v2 = vadd.f32 %v1188_v48, %v701_v1  ;;  %v600_v1 = vsel %vm536_vm15, %v500_v58, %v568_v63  ;;  %v504_v5 = vpop.f32.mrf.mxu3 }
 0x138   : > { %v617_v4 = vpack.c.bf16 %v600_v1, %v599_v0 }
 0x139   : > { %778 = vst [vmem:[%s1193_s6 + $0x10] sm:$0xff] %v702_v2  ;;  %740 = vmatmul.bf16.gmra.mxu2 %v612_v3 }
 0x13e   : > { %v703_v7 = vpop.f32.mrf.mxu1 }
 0x13f   : > { %v704_v8 = vadd.f32 %v1188_v48, %v703_v7  ;;  %v505_v7 = vadd.f32 %v1153_v26, %v504_v5 }
 0x141   : > { %779 = vst [vmem:[%s1193_s6 + $0x18] sm:$0xff] %v704_v8  ;;  %v570_v11 = vmul.f32 0.1, %v505_v7  ;;  %vm538_vm1 = vcmp.gt.f32.partialorder %v505_v7, 0.0 }
 0x143   : > { %v602_v13 = vsel %vm538_vm1, %v505_v7, %v570_v11 }
 0x146   : > { %v706_v14 = vpop.f32.mrf.mxu1 }
 0x147   : > { %v707_v15 = vadd.f32 %v1188_v48, %v706_v14 }
 0x149   : > { %780 = vst [vmem:[%s1193_s6 + $0x20] sm:$0xff] %v707_v15  ;;  %745 = vmatmul.bf16.gmra.mxu2 %v613_v16  ;;  %v618_v16 = vpack.c.bf16 %v602_v13, %v601_v12 }
 0x14e   : > { %v708_v20 = vpop.f32.mrf.mxu1 }
 0x14f   : > { %v709_v21 = vadd.f32 %v1188_v48, %v708_v20 }
 0x151   : > { %781 = vst [vmem:[%s1193_s6 + $0x28] sm:$0xff] %v709_v21 }
 0x156   : > { %v711_v27 = vpop.f32.mrf.mxu1 }
 0x157   : > { %v712_v28 = vadd.f32 %v1188_v48, %v711_v27 }
 0x159   : > { %782 = vst [vmem:[%s1193_s6 + $0x30] sm:$0xff] %v712_v28  ;;  %750 = vmatmul.bf16.gmra.mxu2 %v614_v29 }
 0x15e   : > { %v713_v33 = vpop.f32.mrf.mxu1 }
 0x15f   : > { %v714_v34 = vadd.f32 %v1188_v48, %v713_v33 }
 0x161   : > { %783 = vst [vmem:[%s1193_s6 + $0x38] sm:$0xff] %v714_v34 }
 0x166   : > { %v716_v40 = vpop.f32.mrf.mxu1 }
 0x167   : > { %v717_v41 = vadd.f32 %v1188_v48, %v716_v40 }
 0x169   : > { %784 = vst [vmem:[%s1193_s6 + $0x40] sm:$0xff] %v717_v41  ;;  %755 = vmatmul.bf16.gmra.mxu2 %v615_v42 }
 0x16e   : > { %v718_v46 = vpop.f32.mrf.mxu1 }
 0x16f   : > { %v719_v47 = vadd.f32 %v1188_v48, %v718_v46 }
 0x171   : > { %785 = vst [vmem:[%s1193_s6 + $0x48] sm:$0xff] %v719_v47 }
 0x176   : > { %v721_v54 = vpop.f32.mrf.mxu1 }
 0x177   : > { %v722_v55 = vadd.f32 %v1188_v48, %v721_v54 }
 0x179   : > { %786 = vst [vmem:[%s1193_s6 + $0x50] sm:$0xff] %v722_v55  ;;  %760 = vmatmul.bf16.gmra.mxu2 %v616_v56 }
 0x17e   : > { %v723_v59 = vpop.f32.mrf.mxu1 }
 0x17f   : > { %v724_v60 = vadd.f32 %v1188_v48, %v723_v59 }
 0x181   : > { %787 = vst [vmem:[%s1193_s6 + $0x58] sm:$0xff] %v724_v60 }
 0x186   : > { %v726_v2 = vpop.f32.mrf.mxu1 }
 0x187   : > { %v727_v3 = vadd.f32 %v1188_v48, %v726_v2 }
 0x189   : > { %788 = vst [vmem:[%s1193_s6 + $0x60] sm:$0xff] %v727_v3  ;;  %765 = vmatmul.bf16.gmra.mxu2 %v617_v4 }
 0x18e   : > { %v728_v8 = vpop.f32.mrf.mxu1 }
 0x18f   : > { %v729_v9 = vadd.f32 %v1188_v48, %v728_v8 }
 0x191   : > { %789 = vst [vmem:[%s1193_s6 + $0x68] sm:$0xff] %v729_v9 }
 0x196   : > { %v731_v14 = vpop.f32.mrf.mxu1 }
 0x197   : > { %v732_v15 = vadd.f32 %v1188_v48, %v731_v14 }
 0x199   : > { %790 = vst [vmem:[%s1193_s6 + $0x70] sm:$0xff] %v732_v15  ;;  %770 = vmatmul.bf16.gmra.mxu2 %v618_v16 }
 0x19e   : > { %v733_v26 = vpop.f32.mrf.mxu1 }
 0x19f   : > { %v734_v17 = vadd.f32 %v1188_v48, %v733_v26 }
 0x1a1   : > { %791 = vst [vmem:[%s1193_s6 + $0x78] sm:$0xff] %v734_v17 }
 0x1ac   : > { %v736_v18 = vpop.f32.mrf.mxu2 }
 0x1ad   : > { %v737_v19 = vadd.f32 %v1188_v48, %v736_v18 }
 0x1af   : > { %792 = vst [vmem:[%s1193_s6 + $0x80] sm:$0xff] %v737_v19 }
 0x1b4   : > { %v738_v20 = vpop.f32.mrf.mxu2 }
 0x1b5   : > { %v739_v21 = vadd.f32 %v1188_v48, %v738_v20 }
 0x1b7   : > { %793 = vst [vmem:[%s1193_s6 + $0x88] sm:$0xff] %v739_v21 }
 0x1bc   : > { %v741_v22 = vpop.f32.mrf.mxu2 }
 0x1bd   : > { %v742_v23 = vadd.f32 %v1188_v48, %v741_v22 }
 0x1bf   : > { %794 = vst [vmem:[%s1193_s6 + $0x90] sm:$0xff] %v742_v23 }
 0x1c4   : > { %v743_v24 = vpop.f32.mrf.mxu2 }
 0x1c5   : > { %v744_v25 = vadd.f32 %v1188_v48, %v743_v24 }
 0x1c7   : > { %795 = vst [vmem:[%s1193_s6 + $0x98] sm:$0xff] %v744_v25 }
 0x1cc   : > { %v746_v27 = vpop.f32.mrf.mxu2 }
 0x1cd   : > { %v747_v28 = vadd.f32 %v1188_v48, %v746_v27 }
 0x1cf   : > { %796 = vst [vmem:[%s1193_s6 + $0xa0] sm:$0xff] %v747_v28 }
 0x1d4   : > { %v748_v29 = vpop.f32.mrf.mxu2 }
 0x1d5   : > { %v749_v30 = vadd.f32 %v1188_v48, %v748_v29 }
 0x1d7   : > { %797 = vst [vmem:[%s1193_s6 + $0xa8] sm:$0xff] %v749_v30 }
 0x1dc   : > { %v751_v31 = vpop.f32.mrf.mxu2 }
 0x1dd   : > { %v752_v32 = vadd.f32 %v1188_v48, %v751_v31 }
 0x1df   : > { %798 = vst [vmem:[%s1193_s6 + $0xb0] sm:$0xff] %v752_v32 }
 0x1e4   : > { %v753_v33 = vpop.f32.mrf.mxu2 }
 0x1e5   : > { %v754_v34 = vadd.f32 %v1188_v48, %v753_v33 }
 0x1e7   : > { %799 = vst [vmem:[%s1193_s6 + $0xb8] sm:$0xff] %v754_v34 }
 0x1ec   : > { %v756_v35 = vpop.f32.mrf.mxu2 }
 0x1ed   : > { %v757_v36 = vadd.f32 %v1188_v48, %v756_v35 }
 0x1ef   : > { %800 = vst [vmem:[%s1193_s6 + $0xc0] sm:$0xff] %v757_v36 }
 0x1f4   : > { %v758_v37 = vpop.f32.mrf.mxu2 }
 0x1f5   : > { %v759_v38 = vadd.f32 %v1188_v48, %v758_v37 }
 0x1f7   : > { %801 = vst [vmem:[%s1193_s6 + $0xc8] sm:$0xff] %v759_v38 }
 0x1fc   : > { %v761_v39 = vpop.f32.mrf.mxu2 }
 0x1fd   : > { %v762_v40 = vadd.f32 %v1188_v48, %v761_v39 }
 0x1ff   : > { %802 = vst [vmem:[%s1193_s6 + $0xd0] sm:$0xff] %v762_v40 }
 0x204   : > { %v763_v41 = vpop.f32.mrf.mxu2 }
 0x205   : > { %v764_v42 = vadd.f32 %v1188_v48, %v763_v41 }
 0x207   : > { %803 = vst [vmem:[%s1193_s6 + $0xd8] sm:$0xff] %v764_v42 }
 0x20c   : > { %v766_v43 = vpop.f32.mrf.mxu2 }
 0x20d   : > { %v767_v44 = vadd.f32 %v1188_v48, %v766_v43 }
 0x20f   : > { %804 = vst [vmem:[%s1193_s6 + $0xe0] sm:$0xff] %v767_v44 }
 0x214   : > { %v768_v45 = vpop.f32.mrf.mxu2 }
 0x215   : > { %v769_v46 = vadd.f32 %v1188_v48, %v768_v45 }
 0x217   : > { %805 = vst [vmem:[%s1193_s6 + $0xe8] sm:$0xff] %v769_v46 }
 0x21c   : > { %v771_v47 = vpop.f32.mrf.mxu2 }
 0x21d   : > { %v772_v49 = vadd.f32 %v1188_v48, %v771_v47 }
 0x21f   : > { %806 = vst [vmem:[%s1193_s6 + $0xf0] sm:$0xff] %v772_v49 }
 0x224   : > { %v773_v50 = vpop.f32.mrf.mxu2 }
 0x225   : > { %v774_v51 = vadd.f32 %v1188_v48, %v773_v50 }
 0x227   : > { %807 = vst [vmem:[%s1193_s6 + $0xf8] sm:$0xff] %v774_v51 }
 0x228 PF: > { %s15_s18 = sadd.s32 1, %s1048_s18  }
 0x229   : > { %p12_p4 = scmp.ge.s32.totalorder %s15_s18, 4  }
 0x22b   :  { %14 = sbr.rel (!%p12_p4) target bundleno = 1 (0x1), region = 70 }

</bundles_post_ra>
